<compile_context>
chip_gen: v7x
topology: tpu7x:2x2x1
jax: 0.10.0
libtpu: 0.0.40
codegen_flags: <defaults>
</compile_context>

<pallas_src>
import jax
import jax.numpy as jnp
import numpy as np
from jax import lax
from jax.experimental import pallas as pl
from jax.experimental.pallas import tpu as pltpu

_EPS = 1e-5
_TAPS = tuple((dy, dx) for dy in (-1, 0, 1) for dx in (-1, 0, 1))

# ---------------------------------------------------------------------------
# pltpu.roll convention probe (run once): pins the rotation direction so the
# halo shifts are correct regardless of the rotate sign convention.
# ---------------------------------------------------------------------------
_ROLL_IS_NUMPY = None


def _roll_matches_numpy():
    global _ROLL_IS_NUMPY
    if _ROLL_IS_NUMPY is None:
        def probe(x_ref, o_ref):
            o_ref[...] = pltpu.roll(x_ref[...], 1, 1)

        x = jnp.broadcast_to(jnp.arange(128, dtype=jnp.float32), (8, 128))
        r = pl.pallas_call(
            probe, out_shape=jax.ShapeDtypeStruct((8, 128), jnp.float32))(x)
        # np.roll semantics => result[0, 0] == x[0, -1] == 127
        _ROLL_IS_NUMPY = bool(abs(float(r[0, 0]) - 127.0) < 0.5)
    return _ROLL_IS_NUMPY


# ---------------------------------------------------------------------------
# Host-side helpers: tap validity masks and parameter preparation
# ---------------------------------------------------------------------------
def _tap_masks(h, w):
    """(9, 1, H*W) f32 validity masks (1 = neighbour inside image)."""
    yy, xx = np.meshgrid(np.arange(h), np.arange(w), indexing="ij")
    yy = yy.reshape(-1)
    xx = xx.reshape(-1)
    m = np.zeros((9, 1, h * w), np.float32)
    for t, (dy, dx) in enumerate(_TAPS):
        valid = ((yy + dy >= 0) & (yy + dy < h) &
                 (xx + dx >= 0) & (xx + dx < w))
        m[t, 0, :] = valid.astype(np.float32)
    return jnp.asarray(m)


def _shuffle_inv_perm(c, groups=2):
    # channel_shuffle: out[o] = in[p[o]]; return inverse permutation.
    p = np.arange(c).reshape(groups, c // groups).T.reshape(-1)
    return np.argsort(p)


def init_params(key, inc, outc, reduction=2):
    """Raw (PyTorch-convention) parameters: conv weights OIHW, biases, BN."""
    mid = inc // reduction
    inc4 = mid // 4
    assert inc4 >= 1
    ks = iter(jax.random.split(key, 32))

    def wgt(shape):
        return 0.1 * jax.random.normal(next(ks), shape, jnp.float32)

    def bn(c):
        gamma = 1.0 + 0.1 * jax.random.normal(next(ks), (c,), jnp.float32)
        beta = 0.1 * jax.random.normal(next(ks), (c,), jnp.float32)
        mean = 0.1 * jax.random.normal(next(ks), (c,), jnp.float32)
        var = 1.0 + 0.1 * jax.random.uniform(next(ks), (c,), jnp.float32)
        return (gamma, beta, mean, var)

    return {
        "w0": wgt((mid, inc)), "b0": wgt((mid,)), "bn0": bn(mid),
        "w1": wgt((inc4, inc4, 3, 3)), "b1": wgt((inc4,)), "bn1": bn(inc4),
        "w2": wgt((2 * inc4, 2 * inc4, 3, 3)), "b2": wgt((2 * inc4,)),
        "bn2": bn(2 * inc4),
        "w3": wgt((3 * inc4, 3 * inc4, 3, 3)), "b3": wgt((3 * inc4,)),
        "bn3": bn(3 * inc4),
        "wb": wgt((outc, 7 * inc4)), "bnb": bn(outc),
    }


def prepare_params(raw):
    """Fold BN scale, conv bias and shuffle/concat permutations into weights."""
    def fold(bn_p, bias=None):
        g, b, m, v = bn_p
        scale = g / jnp.sqrt(v + _EPS)
        bias = jnp.zeros_like(m) if bias is None else bias
        return scale, b + (bias - m) * scale

    def taps(w_oihw, scale):
        # (O, I, 3, 3) -> scale-folded (9, O, I); tap t == (ky, kx) row-major.
        wf = w_oihw * scale[:, None, None, None]
        o, i = wf.shape[0], wf.shape[1]
        return jnp.transpose(wf, (2, 3, 0, 1)).reshape(9, o, i)

    mid = raw["w0"].shape[0]
    inc4 = mid // 4
    p = {}

    sc0, sh0 = fold(raw["bn0"], raw["b0"])
    p["w0"] = (raw["w0"] * sc0[:, None]).reshape(4, inc4, -1)   # 4 splits
    p["b0"] = sh0.reshape(4, inc4, 1)

    sc1, sh1 = fold(raw["bn1"], raw["b1"])
    p["w1"] = taps(raw["w1"], sc1)
    p["b1"] = sh1.reshape(inc4, 1)

    sc2, sh2 = fold(raw["bn2"], raw["b2"])
    w2c = raw["w2"][:, _shuffle_inv_perm(2 * inc4)]
    p["w2a"] = taps(w2c[:, :inc4], sc2)          # acts on x1
    p["w2b"] = taps(w2c[:, inc4:], sc2)          # acts on s1
    p["b2"] = sh2.reshape(2 * inc4, 1)

    sc3, sh3 = fold(raw["bn3"], raw["b3"])
    w3c = raw["w3"][:, _shuffle_inv_perm(3 * inc4)]
    p["w3a"] = taps(w3c[:, :2 * inc4], sc3)      # acts on x2
    p["w3b"] = taps(w3c[:, 2 * inc4:], sc3)      # acts on s2
    p["b3"] = sh3.reshape(3 * inc4, 1)

    scb, shb = fold(raw["bnb"], None)
    wbc = raw["wb"][:, _shuffle_inv_perm(7 * inc4)] * scb[:, None]
    p["wb1"] = wbc[:, 0:inc4]                    # acts on x1
    p["wb2"] = wbc[:, inc4:3 * inc4]             # acts on x2
    p["wb3"] = wbc[:, 3 * inc4:6 * inc4]         # acts on x3
    p["wb4"] = wbc[:, 6 * inc4:7 * inc4]         # acts on x4 (maxpool)
    p["bb"] = shb.reshape(-1, 1)
    return p


# ---------------------------------------------------------------------------
# Fused Pallas kernel
# ---------------------------------------------------------------------------
def gs_forward(x_nchw, prep):
    """GS.forward (downsample=None, dp=0) as one fused Pallas kernel."""
    n, inc, h, w = x_nchw.shape
    hw = h * w
    outc = prep["bb"].shape[0]
    assert inc == outc, "residual add requires inc == outc (downsample=None)"
    assert hw % 128 == 0, "H*W must be a multiple of 128 (lane-dense layout)"

    roll_np = _roll_matches_numpy()
    # lane-rotation amount per tap so rolled[:, p] == arr[:, p + dy*W + dx]
    amts = []
    for dy, dx in _TAPS:
        sh = dy * w + dx
        amts.append(((-sh) % hw) if roll_np else (sh % hw))

    masks = _tap_masks(h, w)
    x_flat = x_nchw.reshape(n, inc, hw).astype(jnp.float32)

    def kernel(x_ref, mask_ref, w0_ref, b0_ref, w1_ref, b1_ref,
               w2a_ref, w2b_ref, b2_ref, w3a_ref, w3b_ref, b3_ref,
               wb1_ref, wb2_ref, wb3_ref, wb4_ref, bb_ref, o_ref):
        f32 = jnp.float32
        x = x_ref[0]                      # (inc, hw): lanes = H*W (dense)
        msk = mask_ref[...]               # (9, 1, hw)

        def tap(arr, t):
            # arr[:, p] -> arr[:, p + dy*W + dx], zero outside the image.
            if t == 4:                    # centre tap: identity
                return arr
            return pltpu.roll(arr, amts[t], 1) * msk[t]

        def conv3x3(pieces, b_ref):
            # pieces: [(activation (Ci, hw), tap-weight ref (9, Cout, Ci))]
            acc = None
            for arr, wref in pieces:
                wt = wref[...]
                for t in range(9):
                    c = jnp.dot(wt[t], tap(arr, t),
                                preferred_element_type=f32)
                    acc = c if acc is None else acc + c
            return jnp.clip(acc + b_ref[...], 0.0, 6.0)

        # conv0 (1x1 + BN + ReLU6); weights pre-split into the 4 channel groups
        w0 = w0_ref[...]
        b0 = b0_ref[...]
        s0, s1, s2, s3 = [
            jnp.clip(jnp.dot(w0[k], x, preferred_element_type=f32) + b0[k],
                     0.0, 6.0)
            for k in range(4)
        ]

        # branch chain (channel_shuffle / concat folded into the weights)
        x1 = conv3x3([(s0, w1_ref)], b1_ref)
        x2 = conv3x3([(x1, w2a_ref), (s1, w2b_ref)], b2_ref)
        x3 = conv3x3([(x2, w3a_ref), (s2, w3b_ref)], b3_ref)

        # 3x3 max-pool, stride 1, pad 1 on s3.  s3 >= 0 (post ReLU6), so the
        # zero fill of out-of-image taps never changes the max (centre >= 0).
        x4 = s3
        for t in range(9):
            if t != 4:
                x4 = jnp.maximum(x4, tap(s3, t))

        # base_conv (1x1 + BN + ReLU6) + residual + ReLU6
        yb = (jnp.dot(wb1_ref[...], x1, preferred_element_type=f32)
              + jnp.dot(wb2_ref[...], x2, preferred_element_type=f32)
              + jnp.dot(wb3_ref[...], x3, preferred_element_type=f32)
              + jnp.dot(wb4_ref[...], x4, preferred_element_type=f32))
        yb = jnp.clip(yb + bb_ref[...], 0.0, 6.0)
        o_ref[0] = jnp.clip(x + yb, 0.0, 6.0)

    consts = (masks, prep["w0"], prep["b0"], prep["w1"], prep["b1"],
              prep["w2a"], prep["w2b"], prep["b2"], prep["w3a"], prep["w3b"],
              prep["b3"], prep["wb1"], prep["wb2"], prep["wb3"], prep["wb4"],
              prep["bb"])

    def const_spec(a):
        if a.ndim == 2:
            return pl.BlockSpec(a.shape, lambda i: (0, 0))
        return pl.BlockSpec(a.shape, lambda i: (0, 0, 0))

    out = pl.pallas_call(
        kernel,
        out_shape=jax.ShapeDtypeStruct((n, outc, hw), jnp.float32),
        grid=(n,),
        in_specs=[pl.BlockSpec((1, inc, hw), lambda i: (i, 0, 0))]
        + [const_spec(a) for a in consts],
        out_specs=pl.BlockSpec((1, outc, hw), lambda i: (i, 0, 0)),
        compiler_params=pltpu.CompilerParams(
            dimension_semantics=("parallel",),
            vmem_limit_bytes=32 * 1024 * 1024),
    )(x_flat, *consts)

    return out.reshape(n, outc, h, w)


# ---------------------------------------------------------------------------
# Pure-JAX reference (mirrors the PyTorch module, uses the RAW parameters)
# ---------------------------------------------------------------------------
def gs_forward_ref(x, raw):
    relu6 = lambda z: jnp.clip(z, 0.0, 6.0)

    def bn(z, p):
        g, b, m, v = p
        inv = g / jnp.sqrt(v + _EPS)
        return z * inv[None, :, None, None] + (b - m * inv)[None, :, None, None]

    def conv(z, wgt, bias=None, pad=0):
        out = lax.conv_general_dilated(
            z, wgt, (1, 1), [(pad, pad), (pad, pad)],
            dimension_numbers=("NCHW", "OIHW", "NCHW"))
        if bias is not None:
            out = out + bias[None, :, None, None]
        return out

    def shuffle(z, groups):
        nb, c, hh, ww = z.shape
        z = z.reshape(nb, groups, c // groups, hh, ww)
        z = jnp.swapaxes(z, 1, 2)
        return z.reshape(nb, c, hh, ww)

    res = x
    y = relu6(bn(conv(x, raw["w0"][:, :, None, None], raw["b0"]), raw["bn0"]))
    inc4 = y.shape[1] // 4
    s0, s1, s2, s3 = [y[:, k * inc4:(k + 1) * inc4] for k in range(4)]

    x1 = relu6(bn(conv(s0, raw["w1"], raw["b1"], pad=1), raw["bn1"]))
    t = shuffle(jnp.concatenate([x1, s1], axis=1), 2)
    x2 = relu6(bn(conv(t, raw["w2"], raw["b2"], pad=1), raw["bn2"]))
    t = shuffle(jnp.concatenate([x2, s2], axis=1), 2)
    x3 = relu6(bn(conv(t, raw["w3"], raw["b3"], pad=1), raw["bn3"]))
    x4 = lax.reduce_window(s3, -jnp.inf, lax.max, (1, 1, 3, 3), (1, 1, 1, 1),
                           [(0, 0), (0, 0), (1, 1), (1, 1)])
    t = shuffle(jnp.concatenate([x1, x2, x3, x4], axis=1), 2)
    yb = relu6(bn(conv(t, raw["wb"][:, :, None, None]), raw["bnb"]))
    return relu6(res + yb)


# ---------------------------------------------------------------------------
if __name__ == "__main__":
    key = jax.random.PRNGKey(0)
    kx, kp = jax.random.split(key)

    N, INC, OUTC, H, W = 2, 16, 16, 16, 16     # residual requires INC == OUTC
    x = jax.random.normal(kx, (N, INC, H, W), jnp.float32)   # NCHW (PyTorch)

    raw = init_params(kp, INC, OUTC, reduction=2)
    prep = prepare_params(raw)

    out = jax.block_until_ready(gs_forward(x, prep))
    assert out.shape == (N, OUTC, H, W), out.shape

    ref = jax.block_until_ready(gs_forward_ref(x, raw))
    if not np.allclose(np.asarray(out), np.asarray(ref), rtol=2e-2, atol=2e-2):
        err = float(np.max(np.abs(np.asarray(out) - np.asarray(ref))))
        raise AssertionError(
            f"Pallas GS output mismatches JAX reference (max |err| = {err})")

    # TODO(synk): training-mode BatchNorm (batch statistics), F.dropout (dp=0)
    # and the downsample branch are intentionally not modelled.
    print("KERNEL_OK")
</pallas_src>

<mosaic_0001>
module attributes {stable_mosaic.version = 11 : i64} {
  func.func @probe(%arg0: memref<8x128xf32, #tpu.memory_space<vmem>>, %arg1: memref<8x128xf32, #tpu.memory_space<vmem>>) attributes {dimension_semantics = [], scalar_prefetch = 0 : i64, scratch_operands = 0 : i64, tpu.core_type = #tpu.core_type<tc>} {
    %c0 = arith.constant 0 : index
    %c0_0 = arith.constant 0 : index
    %0 = vector.load %arg0[%c0, %c0_0] : memref<8x128xf32, #tpu.memory_space<vmem>>, vector<8x128xf32>
    %c1_i32 = arith.constant 1 : i32
    %1 = tpu.dynamic_rotate %0 by %c1_i32 dim 1 : vector<8x128xf32>, i32 -> vector<8x128xf32>
    %c0_1 = arith.constant 0 : index
    %c0_2 = arith.constant 0 : index
    %2 = vector.load %arg1[%c0_1, %c0_2] : memref<8x128xf32, #tpu.memory_space<vmem>>, vector<8x128xf32>
    tpu.vector_store %arg1[%c0_1, %c0_2], %1 {strides = array<i32>} : memref<8x128xf32, #tpu.memory_space<vmem>>, vector<8x128xf32>,
    return
  }
}

</mosaic_0001>

<bundles_post_ra>
// kernel: tpu_custom_call.1
= control target key start
LH: loop header
LB: loop body
LE: loop exit
PB: predicated region body
PF: predicated region fallthrough
CT: control target
= control target key end

     0   :  { %6 = vsyncpa [#allocation3], 0  ;;  %s128_s0 = inlined_call_operand.hbm [shape: f32[8,128], index: 0, kind: input, shape index: {}]   ;;  %s129_s1 = inlined_call_operand.hbm [shape: f32[8,128], index: 1, kind: output, shape index: {}]  }
   0x1   :  { %7 = vsyncpa [#allocation4], 0  ;;  %s91_s6 = smov [#allocation2]   ;;  %s43_s10 = scalar_lea.hbm %s128_s0, 128 }
   0x2   :  { %s14_s7 = sshll.u32 %s91_s6, 4  ;;  %p44_p0 = scmp.ne.s32.totalorder %s128_s0, %s43_s10  ;;  %s15_s7 = int_to_ptr.vmem [resolvable:$true] %s14_s7 }
   0x3   :  { %p47_p1 = scmp.lt.u32.totalorder %s43_s10, %s128_s0 }
   0x5   :  { %p49_p2 = pnand %p47_p1, %p44_p0 }
   0x7   :  { %52 = shalt.err (!%p49_p2)
}
   0x8   :  { %s53_s15 = scalar_lea.vmem %s15_s7, 128  ;;  %p58_p4 = scmp.lt.s32.totalorder %s15_s7, %s15_s7 }
   0x9   :  { %p54_p3 = scmp.ne.s32.totalorder %s15_s7, %s53_s15  ;;  %p59_p5 = scmp.lt.s32.totalorder %s53_s15, %s53_s15 }
   0xb   :  { %p60_p6 = por %p59_p5, %p58_p4 }
   0xd   :  { %p61_p7 = pnand %p60_p6, %p54_p3 }
   0xf   :  { %64 = shalt.err (!%p61_p7)
}
  0x10   :  { %17 = dma.hbm_to_vmem [thread:$0]  %s128_s0, 128, %s15_s7, [#allocation3]  }
  0x11   :  { %87 = dma.done.wait [#allocation3], 128  }
  0x12   :  { %88 = vsyncadd [#allocation3], 4294967168  ;;  %v21_v0 = vld [vmem:[#allocation2] sm:$0xff]  ;;  %s92_s18 = smov 1   ;;  %s93_s19 = smov [#allocation5]  }
  0x13   :  { %22 = vrot.lane.b32.xlu0 %v21_v0, %s92_s18  ;;  %s31_s20 = sshll.u32 %s93_s19, 4  ;;  %s32_s20 = int_to_ptr.vmem [resolvable:$true] %s31_s20 }
  0x14   :  { %s65_s21 = scalar_lea.vmem %s32_s20, 128  ;;  %p70_p9 = scmp.lt.s32.totalorder %s32_s20, %s32_s20 }
  0x15   :  { %p66_p8 = scmp.ne.s32.totalorder %s32_s20, %s65_s21  ;;  %p71_p10 = scmp.lt.s32.totalorder %s65_s21, %s65_s21 }
  0x17   :  { %p72_p11 = por %p71_p10, %p70_p9 }
  0x19   :  { %p73_p12 = pnand %p72_p11, %p66_p8 }
  0x85   :  { %v23_v1 = vpop.permute.xlu0 %22 }
  0x86   :  { %24 = vst [vmem:[#allocation5] sm:$0xff] %v23_v1 }
  0x87   :  { %76 = shalt.err (!%p73_p12)
}
  0x88   :  { %s77_s0 = scalar_lea.hbm %s129_s1, 128 }
  0x89   :  { %p78_p13 = scmp.ne.s32.totalorder %s129_s1, %s77_s0  ;;  %p81_p0 = scmp.lt.u32.totalorder %s77_s0, %s129_s1 }
  0x8b   :  { %p83_p1 = pnand %p81_p0, %p78_p13 }
  0x8d   :  { %86 = shalt.err (!%p83_p1)
}
  0x8e   :  { %34 = dma.vmem_to_hbm [thread:$0]  %s32_s20, 128, %s129_s1, [#allocation4]  }
  0x8f   :  { %89 = dma.done.wait [#allocation4], 128  }
  0x90   :  { %90 = vsyncadd [#allocation4], 4294967168 }
  0x91   :  { %38 = vsyncpa [#allocation3], 1 }
  0x92   :  { %39 = vsyncpa [#allocation4], 1 }

</bundles_post_ra>
